<compile_context>
chip_gen: v7x
topology: tpu7x:2x2x1
jax: 0.10.0
libtpu: 0.0.40
codegen_flags: <defaults>
</compile_context>

<pallas_src>
import functools
import math

import jax
import jax.numpy as jnp
from jax.experimental import pallas as pl
from jax.experimental.pallas import tpu as pltpu


def attention_kernel(x_ref, wq_ref, wk_ref, wv_ref, bq_ref, bk_ref, bv_ref,
                     wp_ref, bp_ref, o_ref, *, n_head, seq_len, batch_block):
    """One batch block: fused qkv projection, per-head batched causal attention,
    per-head-fused output projection."""
    M, C = x_ref.shape                  # M = batch_block * seq_len
    T = seq_len
    BB = batch_block
    H = n_head
    hd = C // H
    scale = 1.0 / math.sqrt(hd)
    cdt = x_ref.dtype                   # matmul operand dtype (f32 or bf16)
    f32 = jnp.float32

    x = x_ref[...]

    # --- projections: three tall (M, C) @ (C, C) MXU matmuls, f32 accumulation ---
    q = (jnp.dot(x, wq_ref[...], preferred_element_type=f32) + bq_ref[...]) * scale
    k = jnp.dot(x, wk_ref[...], preferred_element_type=f32) + bk_ref[...]
    v = jnp.dot(x, wv_ref[...], preferred_element_type=f32) + bv_ref[...]

    # --- causal mask (1, T, T), broadcast over the batch dim of each head ---
    row = jax.lax.broadcasted_iota(jnp.int32, (1, T, T), 1)
    col = jax.lax.broadcasted_iota(jnp.int32, (1, T, T), 2)
    mask = row >= col
    neg_big = f32(-1e30)                # finite "masked" score: no -inf - -inf NaN path

    # --- per-head attention. H is small, so a static unroll with tiny (BB,T,T)/(BB,T,hd)
    # intermediates is fine; each head's output projection is fused into the accumulator
    # (concat-then-matmul == sum_h y_h @ Wp_rows[h]), so no scratch slab / narrow stores.
    acc = jnp.zeros((M, C), f32)
    for h in range(H):
        c0 = h * hd
        qh = q[:, c0:c0 + hd].astype(cdt).reshape(BB, T, hd)
        kh = k[:, c0:c0 + hd].astype(cdt).reshape(BB, T, hd)
        vh = v[:, c0:c0 + hd].astype(cdt).reshape(BB, T, hd)

        s = jnp.einsum('bqd,bkd->bqk', qh, kh,
                       preferred_element_type=f32)                  # (BB, T, T) scores
        s = jnp.where(mask, s, neg_big)
        s_max = jnp.max(s, axis=-1, keepdims=True)
        p = jnp.where(mask, jnp.exp(s - s_max), 0.0)                 # masked, unnormalized
        denom = jnp.sum(p, axis=-1, keepdims=True)                   # >= 1 (diag kept)

        ho = jnp.einsum('bqk,bkd->bqd', p.astype(cdt), vh,
                        preferred_element_type=f32)                  # (BB, T, hd)
        # Deferred softmax normalization: one (BB, T, hd) scale via EUP reciprocal.
        ho = ho * pl.reciprocal(denom, approx=True)

        # Fused output projection for this head: (M, hd) @ (hd, C).
        acc = acc + jnp.dot(ho.reshape(M, hd).astype(cdt), wp_ref[c0:c0 + hd, :],
                            preferred_element_type=f32)

    o_ref[...] = (acc + bp_ref[...]).astype(o_ref.dtype)


def attention_forward(x, w_attn, b_attn, w_proj, b_proj, n_head, *,
                      batch_block=None, matmul_dtype=None):
    B, T, C = x.shape
    assert C % n_head == 0
    if batch_block is None:
        batch_block = B                       # collapse the whole batch into one step
    assert B % batch_block == 0
    nb = B // batch_block
    M = batch_block * T
    hd = C // n_head
    out_dtype = x.dtype

    # Split the fused qkv weight/bias on the weight side (free layout plumbing in XLA).
    wq = w_attn[:, 0:C]
    wk = w_attn[:, C:2 * C]
    wv = w_attn[:, 2 * C:3 * C]
    bq = b_attn[:, 0:C].astype(jnp.float32)
    bk = b_attn[:, C:2 * C].astype(jnp.float32)
    bv = b_attn[:, 2 * C:3 * C].astype(jnp.float32)
    bp = b_proj.astype(jnp.float32)
    wp = w_proj

    # Optional bf16 matmul operands (f32 accumulation) for v6e/v7x MXU peak.
    if matmul_dtype is not None:
        x = x.astype(matmul_dtype)
        wq = wq.astype(matmul_dtype)
        wk = wk.astype(matmul_dtype)
        wv = wv.astype(matmul_dtype)
        wp = wp.astype(matmul_dtype)

    x2d = x.reshape(B * T, C)                 # free reshape outside the kernel

    flops = (3 * 2 * B * T * C * C            # q/k/v projections
             + 4 * B * n_head * T * T * hd    # scores + probs @ v
             + 2 * B * T * C * C)             # output projection (per-head fused)
    transcendentals = B * n_head * (T * T + T)    # exp + reciprocal
    bytes_accessed = int(
        x2d.size * x2d.dtype.itemsize
        + sum(int(a.size) * a.dtype.itemsize for a in (wq, wk, wv, bq, bk, bv, wp, bp))
        + B * T * C * jnp.dtype(out_dtype).itemsize)

    kernel = functools.partial(attention_kernel, n_head=n_head, seq_len=T,
                               batch_block=batch_block)

    out2d = pl.pallas_call(
        kernel,
        out_shape=jax.ShapeDtypeStruct((B * T, C), out_dtype),
        grid=(nb,),
        in_specs=[
            pl.BlockSpec((M, C), lambda b: (b, 0)),    # x rows of this batch block
            pl.BlockSpec((C, C), lambda b: (0, 0)),    # Wq
            pl.BlockSpec((C, C), lambda b: (0, 0)),    # Wk
            pl.BlockSpec((C, C), lambda b: (0, 0)),    # Wv
            pl.BlockSpec((1, C), lambda b: (0, 0)),    # bq
            pl.BlockSpec((1, C), lambda b: (0, 0)),    # bk
            pl.BlockSpec((1, C), lambda b: (0, 0)),    # bv
            pl.BlockSpec((C, C), lambda b: (0, 0)),    # Wproj
            pl.BlockSpec((1, C), lambda b: (0, 0)),    # bproj
        ],
        out_specs=pl.BlockSpec((M, C), lambda b: (b, 0)),
        compiler_params=pltpu.CompilerParams(dimension_semantics=("parallel",)),
        cost_estimate=pl.CostEstimate(flops=int(flops),
                                      transcendentals=int(transcendentals),
                                      bytes_accessed=bytes_accessed),
    )(x2d, wq, wk, wv, bq, bk, bv, wp, bp)

    return out2d.reshape(B, T, C)


def attention_reference(x, w_attn, b_attn, w_proj, b_proj, n_head):
    """Pure-JAX f32 reference mirroring the PyTorch forward exactly."""
    B, T, C = x.shape
    hd = C // n_head
    qkv = x @ w_attn + b_attn                      # (B, T, 3C)
    q, k, v = jnp.split(qkv, 3, axis=2)
    q = q.reshape(B, T, n_head, hd).transpose(0, 2, 1, 3)
    k = k.reshape(B, T, n_head, hd).transpose(0, 2, 1, 3)
    v = v.reshape(B, T, n_head, hd).transpose(0, 2, 1, 3)
    att = jnp.einsum("bhqd,bhkd->bhqk", q, k) * (1.0 / math.sqrt(hd))
    mask = jnp.tril(jnp.ones((T, T), dtype=bool))
    att = jnp.where(mask[None, None], att, -jnp.inf)
    att = jax.nn.softmax(att, axis=-1)
    y = jnp.einsum("bhqk,bhkd->bhqd", att, v)
    y = y.transpose(0, 2, 1, 3).reshape(B, T, C)
    return y @ w_proj + b_proj


if __name__ == "__main__":
    # cfg: n_embd=32, n_head=4, block_size=16 ; inputs B=2, T=8 (T <= block_size)
    B, T, C, n_head = 2, 8, 32, 4

    key = jax.random.PRNGKey(0)
    kx, kw1, kb1, kw2, kb2 = jax.random.split(key, 5)

    x = jax.random.normal(kx, (B, T, C), dtype=jnp.float32)
    w_attn = 0.02 * jax.random.normal(kw1, (C, 3 * C), dtype=jnp.float32)
    b_attn = 0.02 * jax.random.normal(kb1, (1, 3 * C), dtype=jnp.float32)
    w_proj = 0.02 * jax.random.normal(kw2, (C, C), dtype=jnp.float32)
    b_proj = 0.02 * jax.random.normal(kb2, (1, C), dtype=jnp.float32)

    ref = attention_reference(x, w_attn, b_attn, w_proj, b_proj, n_head)

    # f32 matmul operands (default) -- tight check (tolerance allows approx reciprocal).
    out = attention_forward(x, w_attn, b_attn, w_proj, b_proj, n_head)
    out = jax.block_until_ready(out)
    assert out.shape == (B, T, C)
    assert jnp.allclose(out, ref, atol=1e-3, rtol=1e-3), "f32 kernel mismatch vs reference"

    # bf16 matmul operands / f32 accumulation (v6e/v7x MXU path) -- looser check.
    out_bf16 = attention_forward(x, w_attn, b_attn, w_proj, b_proj, n_head,
                                 matmul_dtype=jnp.bfloat16)
    out_bf16 = jax.block_until_ready(out_bf16)
    assert out_bf16.shape == (B, T, C)
    assert jnp.allclose(out_bf16, ref, atol=2e-2, rtol=2e-2), "bf16 kernel mismatch vs reference"

    print("KERNEL_OK")
</pallas_src>

<mosaic_0001>
module attributes {stable_mosaic.version = 11 : i64} {
  func.func @attention_kernel(%arg0: i32, %arg1: memref<16x32xf32, #tpu.memory_space<vmem>>, %arg2: memref<32x32xf32, #tpu.memory_space<vmem>>, %arg3: memref<32x32xf32, #tpu.memory_space<vmem>>, %arg4: memref<32x32xf32, #tpu.memory_space<vmem>>, %arg5: memref<1x32xf32, #tpu.memory_space<vmem>>, %arg6: memref<1x32xf32, #tpu.memory_space<vmem>>, %arg7: memref<1x32xf32, #tpu.memory_space<vmem>>, %arg8: memref<32x32xf32, #tpu.memory_space<vmem>>, %arg9: memref<1x32xf32, #tpu.memory_space<vmem>>, %arg10: memref<16x32xf32, #tpu.memory_space<vmem>>) attributes {dimension_semantics = [#tpu.dimension_semantics<parallel>], iteration_bounds = array<i64: 1>, scalar_prefetch = 0 : i64, scratch_operands = 0 : i64, tpu.core_type = #tpu.core_type<tc>, window_params = [{transform_indices = @transform_0, window_bounds = array<i64: 16, 32>}, {pipeline_mode = #tpu.pipeline_mode<synchronous>, transform_indices = @transform_1, window_bounds = array<i64: 32, 32>}, {pipeline_mode = #tpu.pipeline_mode<synchronous>, transform_indices = @transform_2, window_bounds = array<i64: 32, 32>}, {pipeline_mode = #tpu.pipeline_mode<synchronous>, transform_indices = @transform_3, window_bounds = array<i64: 32, 32>}, {pipeline_mode = #tpu.pipeline_mode<synchronous>, transform_indices = @transform_4, window_bounds = array<i64: 1, 32>}, {pipeline_mode = #tpu.pipeline_mode<synchronous>, transform_indices = @transform_5, window_bounds = array<i64: 1, 32>}, {pipeline_mode = #tpu.pipeline_mode<synchronous>, transform_indices = @transform_6, window_bounds = array<i64: 1, 32>}, {pipeline_mode = #tpu.pipeline_mode<synchronous>, transform_indices = @transform_7, window_bounds = array<i64: 32, 32>}, {pipeline_mode = #tpu.pipeline_mode<synchronous>, transform_indices = @transform_8, window_bounds = array<i64: 1, 32>}, {transform_indices = @transform_9, window_bounds = array<i64: 16, 32>}]} {
    %c0 = arith.constant 0 : index
    %c0_0 = arith.constant 0 : index
    %0 = vector.load %arg1[%c0, %c0_0] : memref<16x32xf32, #tpu.memory_space<vmem>>, vector<16x32xf32>
    %c0_1 = arith.constant 0 : index
    %c0_2 = arith.constant 0 : index
    %1 = vector.load %arg2[%c0_1, %c0_2] : memref<32x32xf32, #tpu.memory_space<vmem>>, vector<32x32xf32>
    %cst = arith.constant dense<0.000000e+00> : vector<16x32xf32>
    %2 = tpu.matmul %0, %1, %cst {dimension_numbers = #tpu.dot_dimension_numbers<[1], [0], [0], [1], [0, 0, 1, 1], [], []>} : vector<16x32xf32>, vector<32x32xf32>, vector<16x32xf32> -> vector<16x32xf32>
    %c0_3 = arith.constant 0 : index
    %c0_4 = arith.constant 0 : index
    %3 = vector.load %arg5[%c0_3, %c0_4] : memref<1x32xf32, #tpu.memory_space<vmem>>, vector<1x32xf32>
    %4 = vector.broadcast %3 : vector<1x32xf32> to vector<16x32xf32>
    %5 = arith.addf %2, %4 : vector<16x32xf32>
    %cst_5 = arith.constant 0.353553385 : f32
    %6 = vector.broadcast %cst_5 : f32 to vector<16x32xf32>
    %7 = arith.mulf %5, %6 : vector<16x32xf32>
    %c0_6 = arith.constant 0 : index
    %c0_7 = arith.constant 0 : index
    %8 = vector.load %arg3[%c0_6, %c0_7] : memref<32x32xf32, #tpu.memory_space<vmem>>, vector<32x32xf32>
    %cst_8 = arith.constant dense<0.000000e+00> : vector<16x32xf32>
    %9 = tpu.matmul %0, %8, %cst_8 {dimension_numbers = #tpu.dot_dimension_numbers<[1], [0], [0], [1], [0, 0, 1, 1], [], []>} : vector<16x32xf32>, vector<32x32xf32>, vector<16x32xf32> -> vector<16x32xf32>
    %c0_9 = arith.constant 0 : index
    %c0_10 = arith.constant 0 : index
    %10 = vector.load %arg6[%c0_9, %c0_10] : memref<1x32xf32, #tpu.memory_space<vmem>>, vector<1x32xf32>
    %11 = vector.broadcast %10 : vector<1x32xf32> to vector<16x32xf32>
    %12 = arith.addf %9, %11 : vector<16x32xf32>
    %c0_11 = arith.constant 0 : index
    %c0_12 = arith.constant 0 : index
    %13 = vector.load %arg4[%c0_11, %c0_12] : memref<32x32xf32, #tpu.memory_space<vmem>>, vector<32x32xf32>
    %cst_13 = arith.constant dense<0.000000e+00> : vector<16x32xf32>
    %14 = tpu.matmul %0, %13, %cst_13 {dimension_numbers = #tpu.dot_dimension_numbers<[1], [0], [0], [1], [0, 0, 1, 1], [], []>} : vector<16x32xf32>, vector<32x32xf32>, vector<16x32xf32> -> vector<16x32xf32>
    %c0_14 = arith.constant 0 : index
    %c0_15 = arith.constant 0 : index
    %15 = vector.load %arg7[%c0_14, %c0_15] : memref<1x32xf32, #tpu.memory_space<vmem>>, vector<1x32xf32>
    %16 = vector.broadcast %15 : vector<1x32xf32> to vector<16x32xf32>
    %17 = arith.addf %14, %16 : vector<16x32xf32>
    %18 = tpu.iota {dimensions = array<i32: 1>} : vector<1x8x8xi32>
    %19 = tpu.iota {dimensions = array<i32: 2>} : vector<1x8x8xi32>
    %20 = arith.cmpi sge, %18, %19 : vector<1x8x8xi32>
    %cst_16 = arith.constant 0.000000e+00 : f32
    %21 = vector.broadcast %cst_16 : f32 to vector<16x32xf32>
    %22 = vector.extract_strided_slice %7 {offsets = [0, 0], sizes = [16, 8], strides = [1, 1]} : vector<16x32xf32> to vector<16x8xf32>
    %23 = vector.shape_cast %22 : vector<16x8xf32> to vector<2x8x8xf32>
    %24 = vector.extract_strided_slice %12 {offsets = [0, 0], sizes = [16, 8], strides = [1, 1]} : vector<16x32xf32> to vector<16x8xf32>
    %25 = vector.shape_cast %24 : vector<16x8xf32> to vector<2x8x8xf32>
    %26 = vector.extract_strided_slice %17 {offsets = [0, 0], sizes = [16, 8], strides = [1, 1]} : vector<16x32xf32> to vector<16x8xf32>
    %27 = vector.shape_cast %26 : vector<16x8xf32> to vector<2x8x8xf32>
    "tpu.trace_start"() <{level = 10 : i32, message = "bqd,bkd->bqk"}> : () -> ()
    %cst_17 = arith.constant dense<0.000000e+00> : vector<2x8x8xf32>
    %28 = tpu.matmul %23, %25, %cst_17 {dimension_numbers = #tpu.dot_dimension_numbers<[2], [2], [1], [1], [0, 0, 0, 1, 1, 1], [0], [0]>} : vector<2x8x8xf32>, vector<2x8x8xf32>, vector<2x8x8xf32> -> vector<2x8x8xf32>
    %cst_18 = arith.constant -1.000000e+30 : f32
    "tpu.trace_stop"() : () -> ()
    %29 = vector.shape_cast %20 : vector<1x8x8xi1> to vector<1x8x8xi1>
    %30 = vector.broadcast %29 : vector<1x8x8xi1> to vector<2x8x8xi1>
    %31 = vector.broadcast %cst_18 : f32 to vector<2x8x8xf32>
    %32 = arith.select %30, %28, %31 : vector<2x8x8xi1>, vector<2x8x8xf32>
    %cst_19 = arith.constant dense<0xFF800000> : vector<2x8xf32>
    %33 = vector.multi_reduction <maximumf>, %32, %cst_19 [2] : vector<2x8x8xf32> to vector<2x8xf32>
    %34 = vector.shape_cast %33 : vector<2x8xf32> to vector<2x8x1xf32>
    %35 = vector.broadcast %34 : vector<2x8x1xf32> to vector<2x8x8xf32>
    %36 = arith.subf %32, %35 : vector<2x8x8xf32>
    %37 = math.exp %36 : vector<2x8x8xf32>
    %cst_20 = arith.constant 0.000000e+00 : f32
    %38 = vector.shape_cast %20 : vector<1x8x8xi1> to vector<1x8x8xi1>
    %39 = vector.broadcast %38 : vector<1x8x8xi1> to vector<2x8x8xi1>
    %40 = vector.broadcast %cst_20 : f32 to vector<2x8x8xf32>
    %41 = arith.select %39, %37, %40 : vector<2x8x8xi1>, vector<2x8x8xf32>
    %cst_21 = arith.constant dense<0.000000e+00> : vector<2x8xf32>
    %42 = vector.multi_reduction <add>, %41, %cst_21 [2] : vector<2x8x8xf32> to vector<2x8xf32>
    %43 = vector.shape_cast %42 : vector<2x8xf32> to vector<2x8x1xf32>
    "tpu.trace_start"() <{level = 10 : i32, message = "bqk,bkd->bqd"}> : () -> ()
    %cst_22 = arith.constant dense<0.000000e+00> : vector<2x8x8xf32>
    %44 = tpu.matmul %41, %27, %cst_22 {dimension_numbers = #tpu.dot_dimension_numbers<[2], [1], [1], [2], [0, 0, 0, 1, 1, 2], [0], [0]>} : vector<2x8x8xf32>, vector<2x8x8xf32>, vector<2x8x8xf32> -> vector<2x8x8xf32>
    "tpu.trace_stop"() : () -> ()
    %45 = tpu.reciprocal %43 {approx = true} : vector<2x8x1xf32> -> vector<2x8x1xf32>
    %46 = vector.broadcast %45 : vector<2x8x1xf32> to vector<2x8x8xf32>
    %47 = arith.mulf %44, %46 : vector<2x8x8xf32>
    %48 = vector.shape_cast %47 : vector<2x8x8xf32> to vector<16x8xf32>
    %c0_23 = arith.constant 0 : index
    %c0_24 = arith.constant 0 : index
    %49 = vector.load %arg8[%c0_23, %c0_24] : memref<32x32xf32, #tpu.memory_space<vmem>>, vector<8x32xf32>
    %cst_25 = arith.constant dense<0.000000e+00> : vector<16x32xf32>
    %50 = tpu.matmul %48, %49, %cst_25 {dimension_numbers = #tpu.dot_dimension_numbers<[1], [0], [0], [1], [0, 0, 1, 1], [], []>} : vector<16x8xf32>, vector<8x32xf32>, vector<16x32xf32> -> vector<16x32xf32>
    %51 = arith.addf %21, %50 : vector<16x32xf32>
    %52 = vector.extract_strided_slice %7 {offsets = [0, 8], sizes = [16, 8], strides = [1, 1]} : vector<16x32xf32> to vector<16x8xf32>
    %53 = vector.shape_cast %52 : vector<16x8xf32> to vector<2x8x8xf32>
    %54 = vector.extract_strided_slice %12 {offsets = [0, 8], sizes = [16, 8], strides = [1, 1]} : vector<16x32xf32> to vector<16x8xf32>
    %55 = vector.shape_cast %54 : vector<16x8xf32> to vector<2x8x8xf32>
    %56 = vector.extract_strided_slice %17 {offsets = [0, 8], sizes = [16, 8], strides = [1, 1]} : vector<16x32xf32> to vector<16x8xf32>
    %57 = vector.shape_cast %56 : vector<16x8xf32> to vector<2x8x8xf32>
    "tpu.trace_start"() <{level = 10 : i32, message = "bqd,bkd->bqk"}> : () -> ()
    %cst_26 = arith.constant dense<0.000000e+00> : vector<2x8x8xf32>
    %58 = tpu.matmul %53, %55, %cst_26 {dimension_numbers = #tpu.dot_dimension_numbers<[2], [2], [1], [1], [0, 0, 0, 1, 1, 1], [0], [0]>} : vector<2x8x8xf32>, vector<2x8x8xf32>, vector<2x8x8xf32> -> vector<2x8x8xf32>
    %cst_27 = arith.constant -1.000000e+30 : f32
    "tpu.trace_stop"() : () -> ()
    %59 = vector.shape_cast %20 : vector<1x8x8xi1> to vector<1x8x8xi1>
    %60 = vector.broadcast %59 : vector<1x8x8xi1> to vector<2x8x8xi1>
    %61 = vector.broadcast %cst_27 : f32 to vector<2x8x8xf32>
    %62 = arith.select %60, %58, %61 : vector<2x8x8xi1>, vector<2x8x8xf32>
    %cst_28 = arith.constant dense<0xFF800000> : vector<2x8xf32>
    %63 = vector.multi_reduction <maximumf>, %62, %cst_28 [2] : vector<2x8x8xf32> to vector<2x8xf32>
    %64 = vector.shape_cast %63 : vector<2x8xf32> to vector<2x8x1xf32>
    %65 = vector.broadcast %64 : vector<2x8x1xf32> to vector<2x8x8xf32>
    %66 = arith.subf %62, %65 : vector<2x8x8xf32>
    %67 = math.exp %66 : vector<2x8x8xf32>
    %cst_29 = arith.constant 0.000000e+00 : f32
    %68 = vector.shape_cast %20 : vector<1x8x8xi1> to vector<1x8x8xi1>
    %69 = vector.broadcast %68 : vector<1x8x8xi1> to vector<2x8x8xi1>
    %70 = vector.broadcast %cst_29 : f32 to vector<2x8x8xf32>
    %71 = arith.select %69, %67, %70 : vector<2x8x8xi1>, vector<2x8x8xf32>
    %cst_30 = arith.constant dense<0.000000e+00> : vector<2x8xf32>
    %72 = vector.multi_reduction <add>, %71, %cst_30 [2] : vector<2x8x8xf32> to vector<2x8xf32>
    %73 = vector.shape_cast %72 : vector<2x8xf32> to vector<2x8x1xf32>
    "tpu.trace_start"() <{level = 10 : i32, message = "bqk,bkd->bqd"}> : () -> ()
    %cst_31 = arith.constant dense<0.000000e+00> : vector<2x8x8xf32>
    %74 = tpu.matmul %71, %57, %cst_31 {dimension_numbers = #tpu.dot_dimension_numbers<[2], [1], [1], [2], [0, 0, 0, 1, 1, 2], [0], [0]>} : vector<2x8x8xf32>, vector<2x8x8xf32>, vector<2x8x8xf32> -> vector<2x8x8xf32>
    "tpu.trace_stop"() : () -> ()
    %75 = tpu.reciprocal %73 {approx = true} : vector<2x8x1xf32> -> vector<2x8x1xf32>
    %76 = vector.broadcast %75 : vector<2x8x1xf32> to vector<2x8x8xf32>
    %77 = arith.mulf %74, %76 : vector<2x8x8xf32>
    %78 = vector.shape_cast %77 : vector<2x8x8xf32> to vector<16x8xf32>
    %c8 = arith.constant 8 : index
    %c0_32 = arith.constant 0 : index
    %79 = vector.load %arg8[%c8, %c0_32] : memref<32x32xf32, #tpu.memory_space<vmem>>, vector<8x32xf32>
    %cst_33 = arith.constant dense<0.000000e+00> : vector<16x32xf32>
    %80 = tpu.matmul %78, %79, %cst_33 {dimension_numbers = #tpu.dot_dimension_numbers<[1], [0], [0], [1], [0, 0, 1, 1], [], []>} : vector<16x8xf32>, vector<8x32xf32>, vector<16x32xf32> -> vector<16x32xf32>
    %81 = arith.addf %51, %80 : vector<16x32xf32>
    %82 = vector.extract_strided_slice %7 {offsets = [0, 16], sizes = [16, 8], strides = [1, 1]} : vector<16x32xf32> to vector<16x8xf32>
    %83 = vector.shape_cast %82 : vector<16x8xf32> to vector<2x8x8xf32>
    %84 = vector.extract_strided_slice %12 {offsets = [0, 16], sizes = [16, 8], strides = [1, 1]} : vector<16x32xf32> to vector<16x8xf32>
    %85 = vector.shape_cast %84 : vector<16x8xf32> to vector<2x8x8xf32>
    %86 = vector.extract_strided_slice %17 {offsets = [0, 16], sizes = [16, 8], strides = [1, 1]} : vector<16x32xf32> to vector<16x8xf32>
    %87 = vector.shape_cast %86 : vector<16x8xf32> to vector<2x8x8xf32>
    "tpu.trace_start"() <{level = 10 : i32, message = "bqd,bkd->bqk"}> : () -> ()
    %cst_34 = arith.constant dense<0.000000e+00> : vector<2x8x8xf32>
    %88 = tpu.matmul %83, %85, %cst_34 {dimension_numbers = #tpu.dot_dimension_numbers<[2], [2], [1], [1], [0, 0, 0, 1, 1, 1], [0], [0]>} : vector<2x8x8xf32>, vector<2x8x8xf32>, vector<2x8x8xf32> -> vector<2x8x8xf32>
    %cst_35 = arith.constant -1.000000e+30 : f32
    "tpu.trace_stop"() : () -> ()
    %89 = vector.shape_cast %20 : vector<1x8x8xi1> to vector<1x8x8xi1>
    %90 = vector.broadcast %89 : vector<1x8x8xi1> to vector<2x8x8xi1>
    %91 = vector.broadcast %cst_35 : f32 to vector<2x8x8xf32>
    %92 = arith.select %90, %88, %91 : vector<2x8x8xi1>, vector<2x8x8xf32>
    %cst_36 = arith.constant dense<0xFF800000> : vector<2x8xf32>
    %93 = vector.multi_reduction <maximumf>, %92, %cst_36 [2] : vector<2x8x8xf32> to vector<2x8xf32>
    %94 = vector.shape_cast %93 : vector<2x8xf32> to vector<2x8x1xf32>
    %95 = vector.broadcast %94 : vector<2x8x1xf32> to vector<2x8x8xf32>
    %96 = arith.subf %92, %95 : vector<2x8x8xf32>
    %97 = math.exp %96 : vector<2x8x8xf32>
    %cst_37 = arith.constant 0.000000e+00 : f32
    %98 = vector.shape_cast %20 : vector<1x8x8xi1> to vector<1x8x8xi1>
    %99 = vector.broadcast %98 : vector<1x8x8xi1> to vector<2x8x8xi1>
    %100 = vector.broadcast %cst_37 : f32 to vector<2x8x8xf32>
    %101 = arith.select %99, %97, %100 : vector<2x8x8xi1>, vector<2x8x8xf32>
    %cst_38 = arith.constant dense<0.000000e+00> : vector<2x8xf32>
    %102 = vector.multi_reduction <add>, %101, %cst_38 [2] : vector<2x8x8xf32> to vector<2x8xf32>
    %103 = vector.shape_cast %102 : vector<2x8xf32> to vector<2x8x1xf32>
    "tpu.trace_start"() <{level = 10 : i32, message = "bqk,bkd->bqd"}> : () -> ()
    %cst_39 = arith.constant dense<0.000000e+00> : vector<2x8x8xf32>
    %104 = tpu.matmul %101, %87, %cst_39 {dimension_numbers = #tpu.dot_dimension_numbers<[2], [1], [1], [2], [0, 0, 0, 1, 1, 2], [0], [0]>} : vector<2x8x8xf32>, vector<2x8x8xf32>, vector<2x8x8xf32> -> vector<2x8x8xf32>
    "tpu.trace_stop"() : () -> ()
    %105 = tpu.reciprocal %103 {approx = true} : vector<2x8x1xf32> -> vector<2x8x1xf32>
    %106 = vector.broadcast %105 : vector<2x8x1xf32> to vector<2x8x8xf32>
    %107 = arith.mulf %104, %106 : vector<2x8x8xf32>
    %108 = vector.shape_cast %107 : vector<2x8x8xf32> to vector<16x8xf32>
    %c16 = arith.constant 16 : index
    %c0_40 = arith.constant 0 : index
    %109 = vector.load %arg8[%c16, %c0_40] : memref<32x32xf32, #tpu.memory_space<vmem>>, vector<8x32xf32>
    %cst_41 = arith.constant dense<0.000000e+00> : vector<16x32xf32>
    %110 = tpu.matmul %108, %109, %cst_41 {dimension_numbers = #tpu.dot_dimension_numbers<[1], [0], [0], [1], [0, 0, 1, 1], [], []>} : vector<16x8xf32>, vector<8x32xf32>, vector<16x32xf32> -> vector<16x32xf32>
    %111 = arith.addf %81, %110 : vector<16x32xf32>
    %112 = vector.extract_strided_slice %7 {offsets = [0, 24], sizes = [16, 8], strides = [1, 1]} : vector<16x32xf32> to vector<16x8xf32>
    %113 = vector.shape_cast %112 : vector<16x8xf32> to vector<2x8x8xf32>
    %114 = vector.extract_strided_slice %12 {offsets = [0, 24], sizes = [16, 8], strides = [1, 1]} : vector<16x32xf32> to vector<16x8xf32>
    %115 = vector.shape_cast %114 : vector<16x8xf32> to vector<2x8x8xf32>
    %116 = vector.extract_strided_slice %17 {offsets = [0, 24], sizes = [16, 8], strides = [1, 1]} : vector<16x32xf32> to vector<16x8xf32>
    %117 = vector.shape_cast %116 : vector<16x8xf32> to vector<2x8x8xf32>
    "tpu.trace_start"() <{level = 10 : i32, message = "bqd,bkd->bqk"}> : () -> ()
    %cst_42 = arith.constant dense<0.000000e+00> : vector<2x8x8xf32>
    %118 = tpu.matmul %113, %115, %cst_42 {dimension_numbers = #tpu.dot_dimension_numbers<[2], [2], [1], [1], [0, 0, 0, 1, 1, 1], [0], [0]>} : vector<2x8x8xf32>, vector<2x8x8xf32>, vector<2x8x8xf32> -> vector<2x8x8xf32>
    %cst_43 = arith.constant -1.000000e+30 : f32
    "tpu.trace_stop"() : () -> ()
    %119 = vector.shape_cast %20 : vector<1x8x8xi1> to vector<1x8x8xi1>
    %120 = vector.broadcast %119 : vector<1x8x8xi1> to vector<2x8x8xi1>
    %121 = vector.broadcast %cst_43 : f32 to vector<2x8x8xf32>
    %122 = arith.select %120, %118, %121 : vector<2x8x8xi1>, vector<2x8x8xf32>
    %cst_44 = arith.constant dense<0xFF800000> : vector<2x8xf32>
    %123 = vector.multi_reduction <maximumf>, %122, %cst_44 [2] : vector<2x8x8xf32> to vector<2x8xf32>
    %124 = vector.shape_cast %123 : vector<2x8xf32> to vector<2x8x1xf32>
    %125 = vector.broadcast %124 : vector<2x8x1xf32> to vector<2x8x8xf32>
    %126 = arith.subf %122, %125 : vector<2x8x8xf32>
    %127 = math.exp %126 : vector<2x8x8xf32>
    %cst_45 = arith.constant 0.000000e+00 : f32
    %128 = vector.shape_cast %20 : vector<1x8x8xi1> to vector<1x8x8xi1>
    %129 = vector.broadcast %128 : vector<1x8x8xi1> to vector<2x8x8xi1>
    %130 = vector.broadcast %cst_45 : f32 to vector<2x8x8xf32>
    %131 = arith.select %129, %127, %130 : vector<2x8x8xi1>, vector<2x8x8xf32>
    %cst_46 = arith.constant dense<0.000000e+00> : vector<2x8xf32>
    %132 = vector.multi_reduction <add>, %131, %cst_46 [2] : vector<2x8x8xf32> to vector<2x8xf32>
    %133 = vector.shape_cast %132 : vector<2x8xf32> to vector<2x8x1xf32>
    "tpu.trace_start"() <{level = 10 : i32, message = "bqk,bkd->bqd"}> : () -> ()
    %cst_47 = arith.constant dense<0.000000e+00> : vector<2x8x8xf32>
    %134 = tpu.matmul %131, %117, %cst_47 {dimension_numbers = #tpu.dot_dimension_numbers<[2], [1], [1], [2], [0, 0, 0, 1, 1, 2], [0], [0]>} : vector<2x8x8xf32>, vector<2x8x8xf32>, vector<2x8x8xf32> -> vector<2x8x8xf32>
    "tpu.trace_stop"() : () -> ()
    %135 = tpu.reciprocal %133 {approx = true} : vector<2x8x1xf32> -> vector<2x8x1xf32>
    %136 = vector.broadcast %135 : vector<2x8x1xf32> to vector<2x8x8xf32>
    %137 = arith.mulf %134, %136 : vector<2x8x8xf32>
    %138 = vector.shape_cast %137 : vector<2x8x8xf32> to vector<16x8xf32>
    %c24 = arith.constant 24 : index
    %c0_48 = arith.constant 0 : index
    %139 = vector.load %arg8[%c24, %c0_48] : memref<32x32xf32, #tpu.memory_space<vmem>>, vector<8x32xf32>
    %cst_49 = arith.constant dense<0.000000e+00> : vector<16x32xf32>
    %140 = tpu.matmul %138, %139, %cst_49 {dimension_numbers = #tpu.dot_dimension_numbers<[1], [0], [0], [1], [0, 0, 1, 1], [], []>} : vector<16x8xf32>, vector<8x32xf32>, vector<16x32xf32> -> vector<16x32xf32>
    %141 = arith.addf %111, %140 : vector<16x32xf32>
    %c0_50 = arith.constant 0 : index
    %c0_51 = arith.constant 0 : index
    %142 = vector.load %arg9[%c0_50, %c0_51] : memref<1x32xf32, #tpu.memory_space<vmem>>, vector<1x32xf32>
    %143 = vector.broadcast %142 : vector<1x32xf32> to vector<16x32xf32>
    %144 = arith.addf %141, %143 : vector<16x32xf32>
    %c0_52 = arith.constant 0 : index
    %c0_53 = arith.constant 0 : index
    %145 = vector.load %arg10[%c0_52, %c0_53] : memref<16x32xf32, #tpu.memory_space<vmem>>, vector<16x32xf32>
    tpu.vector_store %arg10[%c0_52, %c0_53], %144 {strides = array<i32>} : memref<16x32xf32, #tpu.memory_space<vmem>>, vector<16x32xf32>,
    return
  }
  func.func @transform_0(%arg0: i32) -> (i32, i32) {
    %c0_i32 = arith.constant 0 : i32
    %c0_i32_0 = arith.constant 0 : i32
    return %arg0, %c0_i32 : i32, i32
  }
  func.func @transform_1(%arg0: i32) -> (i32, i32) {
    %c0_i32 = arith.constant 0 : i32
    %c0_i32_0 = arith.constant 0 : i32
    %c0_i32_1 = arith.constant 0 : i32
    return %c0_i32, %c0_i32_0 : i32, i32
  }
  func.func @transform_2(%arg0: i32) -> (i32, i32) {
    %c0_i32 = arith.constant 0 : i32
    %c0_i32_0 = arith.constant 0 : i32
    %c0_i32_1 = arith.constant 0 : i32
    return %c0_i32, %c0_i32_0 : i32, i32
  }
  func.func @transform_3(%arg0: i32) -> (i32, i32) {
    %c0_i32 = arith.constant 0 : i32
    %c0_i32_0 = arith.constant 0 : i32
    %c0_i32_1 = arith.constant 0 : i32
    return %c0_i32, %c0_i32_0 : i32, i32
  }
  func.func @transform_4(%arg0: i32) -> (i32, i32) {
    %c0_i32 = arith.constant 0 : i32
    %c0_i32_0 = arith.constant 0 : i32
    %c0_i32_1 = arith.constant 0 : i32
    return %c0_i32, %c0_i32_0 : i32, i32
  }
  func.func @transform_5(%arg0: i32) -> (i32, i32) {
    %c0_i32 = arith.constant 0 : i32
    %c0_i32_0 = arith.constant 0 : i32
    %c0_i32_1 = arith.constant 0 : i32
    return %c0_i32, %c0_i32_0 : i32, i32
  }
  func.func @transform_6(%arg0: i32) -> (i32, i32) {
    %c0_i32 = arith.constant 0 : i32
    %c0_i32_0 = arith.constant 0 : i32
    %c0_i32_1 = arith.constant 0 : i32
    return %c0_i32, %c0_i32_0 : i32, i32
  }
  func.func @transform_7(%arg0: i32) -> (i32, i32) {
    %c0_i32 = arith.constant 0 : i32
    %c0_i32_0 = arith.constant 0 : i32
    %c0_i32_1 = arith.constant 0 : i32
    return %c0_i32, %c0_i32_0 : i32, i32
  }
  func.func @transform_8(%arg0: i32) -> (i32, i32) {
    %c0_i32 = arith.constant 0 : i32
    %c0_i32_0 = arith.constant 0 : i32
    %c0_i32_1 = arith.constant 0 : i32
    return %c0_i32, %c0_i32_0 : i32, i32
  }
  func.func @transform_9(%arg0: i32) -> (i32, i32) {
    %c0_i32 = arith.constant 0 : i32
    %c0_i32_0 = arith.constant 0 : i32
    return %arg0, %c0_i32 : i32, i32
  }
}

</mosaic_0001>

<bundles_post_ra>
// kernel: tpu_custom_call.1
= control target key start
LH: loop header
LB: loop body
LE: loop exit
PB: predicated region body
PF: predicated region fallthrough
CT: control target
= control target key end

     0   :  { %14 = vsyncpa [#allocation3], 0  ;;  %s2899_s0 = inlined_call_operand.hbm [shape: f32[16,32], index: 0, kind: input, shape index: {}]   ;;  %s2900_s1 = inlined_call_operand.hbm [shape: f32[32,32], index: 1, kind: input, shape index: {}]   ;;  %s2901_s2 = inlined_call_operand.hbm [shape: f32[32,32], index: 2, kind: input, shape index: {}]   ;;  %s2902_s3 = inlined_call_operand.hbm [shape: f32[32,32], index: 3, kind: input, shape index: {}]   ;;  %s2903_s4 = inlined_call_operand.vmem [shape: f32[1,32], index: 4, kind: input, shape index: {}]   ;;  %s2904_s5 = inlined_call_operand.vmem [shape: f32[1,32], index: 5, kind: input, shape index: {}]   ;;  %s2905_s6 = inlined_call_operand.vmem [shape: f32[1,32], index: 6, kind: input, shape index: {}]   ;;  %s2906_s7 = inlined_call_operand.hbm [shape: f32[32,32], index: 7, kind: input, shape index: {}]   ;;  %s2907_s8 = inlined_call_operand.vmem [shape: f32[1,32], index: 8, kind: input, shape index: {}]   ;;  %s2908_s9 = inlined_call_operand.hbm [shape: f32[16,32], index: 9, kind: output, shape index: {}]  }
   0x1   :  { %15 = vsyncpa [#allocation6], 0 }
   0x2   :  { %16 = vsyncpa [#allocation9], 0 }
   0x3   :  { %17 = vsyncpa [#allocation4], 0  ;;  %s2520_s30 = smov [#allocation5]   ;;  %s2521_s11 = smov [#allocation8]  }
   0x4   :  { %s35_s10 = sshll.u32 %s2520_s30, 4  ;;  %s59_s12 = sshll.u32 %s2521_s11, 4  ;;  %s36_s10 = int_to_ptr.vmem [resolvable:$true] %s35_s10  ;;  %s2583_s12 = int_to_ptr.vmem [resolvable:$true] %s59_s12 }
   0x5   :  { %s2380_s15 = scalar_lea.hbm %s2900_s1, 512 }
   0x6   :  { %p2381_p0 = scmp.ne.s32.totalorder %s2900_s1, %s2380_s15  ;;  %p2384_p1 = scmp.lt.u32.totalorder %s2380_s15, %s2900_s1 }
   0x8   :  { %p2386_p2 = pnand %p2384_p1, %p2381_p0 }
   0xa   :  { %2389 = shalt.err (!%p2386_p2)
}
   0xb   :  { %s2390_s20 = scalar_lea.vmem %s36_s10, 512  ;;  %p2395_p4 = scmp.lt.s32.totalorder %s36_s10, %s36_s10 }
   0xc   :  { %p2391_p3 = scmp.ne.s32.totalorder %s36_s10, %s2390_s20  ;;  %p2396_p5 = scmp.lt.s32.totalorder %s2390_s20, %s2390_s20 }
   0xe   :  { %p2397_p6 = por %p2396_p5, %p2395_p4 }
  0x10   :  { %p2398_p7 = pnand %p2397_p6, %p2391_p3 }
  0x12   :  { %2401 = shalt.err (!%p2398_p7)
}
  0x13   :  { %s2522_s21 = smov 128   ;;  %s2523_s22 = smov 8  }
  0x14   :  { %41 = dma.hbm_to_vmem [thread:$0]  %s2900_s1, 512, %s36_s10, [#allocation6], %s2522_s21, %s2522_s21, %s2523_s22  }
  0x15   :  { %s2402_s27 = scalar_lea.hbm %s2902_s3, 512 }
  0x16   :  { %p2403_p8 = scmp.ne.s32.totalorder %s2902_s3, %s2402_s27  ;;  %p2406_p9 = scmp.lt.u32.totalorder %s2402_s27, %s2902_s3 }
  0x18   :  { %p2408_p10 = pnand %p2406_p9, %p2403_p8 }
  0x1a   :  { %2411 = shalt.err (!%p2408_p10)
}
  0x1b   :  { %s2412_s13 = scalar_lea.vmem %s2583_s12, 512  ;;  %p2417_p12 = scmp.lt.s32.totalorder %s2583_s12, %s2583_s12 }
  0x1c   :  { %p2413_p11 = scmp.ne.s32.totalorder %s2583_s12, %s2412_s13  ;;  %p2418_p13 = scmp.lt.s32.totalorder %s2412_s13, %s2412_s13 }
  0x1e   :  { %p2419_p0 = por %p2418_p13, %p2417_p12 }
  0x20   :  { %p2420_p1 = pnand %p2419_p0, %p2413_p11 }
  0x22   :  { %2423 = shalt.err (!%p2420_p1)
}
  0x23   :  { %65 = dma.hbm_to_vmem [thread:$0]  %s2902_s3, 512, %s2583_s12, [#allocation9], %s2522_s21, %s2522_s21, %s2523_s22  }
  0x24   :  { %s2524_s14 = smov [#allocation2]   ;;  %s2525_s16 = smov [#allocation7]  }
  0x25   :  { %s23_s15 = sshll.u32 %s2524_s14, 4  ;;  %s47_s17 = sshll.u32 %s2525_s16, 4  ;;  %s24_s15 = int_to_ptr.vmem [resolvable:$true] %s23_s15  ;;  %s2620_s17 = int_to_ptr.vmem [resolvable:$true] %s47_s17 }
  0x26   :  { %s2424_s20 = scalar_lea.hbm %s2899_s0, 256 }
  0x27   :  { %p2425_p2 = scmp.ne.s32.totalorder %s2899_s0, %s2424_s20  ;;  %p2428_p3 = scmp.lt.u32.totalorder %s2424_s20, %s2899_s0 }
  0x29   :  { %p2430_p4 = pnand %p2428_p3, %p2425_p2 }
  0x2b   :  { %2433 = shalt.err (!%p2430_p4)
}
  0x2c   :  { %s2434_s3 = scalar_lea.vmem %s24_s15, 256  ;;  %p2439_p6 = scmp.lt.s32.totalorder %s24_s15, %s24_s15 }
  0x2d   :  { %p2435_p5 = scmp.ne.s32.totalorder %s24_s15, %s2434_s3  ;;  %p2440_p7 = scmp.lt.s32.totalorder %s2434_s3, %s2434_s3 }
  0x2f   :  { %p2441_p8 = por %p2440_p7, %p2439_p6 }
  0x31   :  { %p2442_p9 = pnand %p2441_p8, %p2435_p5 }
  0x33   :  { %2445 = shalt.err (!%p2442_p9)
}
  0x34   :  { %29 = dma.hbm_to_vmem [thread:$0]  %s2899_s0, 256, %s24_s15, [#allocation3], %s2522_s21, %s2522_s21, %s2523_s22  }
  0x35   :  { %s2446_s30 = scalar_lea.hbm %s2901_s2, 512 }
  0x36   :  { %p2447_p10 = scmp.ne.s32.totalorder %s2901_s2, %s2446_s30  ;;  %p2450_p11 = scmp.lt.u32.totalorder %s2446_s30, %s2901_s2 }
  0x38   :  { %p2452_p12 = pnand %p2450_p11, %p2447_p10 }
  0x3a   :  { %2455 = shalt.err (!%p2452_p12)
}
  0x3b   :  { %s2456_s14 = scalar_lea.vmem %s2620_s17, 512  ;;  %p2461_p0 = scmp.lt.s32.totalorder %s2620_s17, %s2620_s17 }
  0x3c   :  { %p2457_p13 = scmp.ne.s32.totalorder %s2620_s17, %s2456_s14  ;;  %p2462_p1 = scmp.lt.s32.totalorder %s2456_s14, %s2456_s14 }
  0x3e   :  { %p2463_p2 = por %p2462_p1, %p2461_p0 }
  0x40   :  { %p2464_p3 = pnand %p2463_p2, %p2457_p13 }
  0x42   :  { %2467 = shalt.err (!%p2464_p3)
}
  0x43   :  { %53 = dma.hbm_to_vmem [thread:$0]  %s2901_s2, 512, %s2620_s17, [#allocation6], %s2522_s21, %s2522_s21, %s2523_s22  }
  0x44   :  { %s2526_s16 = smov [#allocation10]   ;;  %s2468_s23 = scalar_lea.hbm %s2906_s7, 512 }
  0x45   :  { %s77_s18 = sshll.u32 %s2526_s16, 4  ;;  %p2469_p4 = scmp.ne.s32.totalorder %s2906_s7, %s2468_s23  ;;  %s78_s18 = int_to_ptr.vmem [resolvable:$true] %s77_s18 }
  0x46   :  { %p2472_p5 = scmp.lt.u32.totalorder %s2468_s23, %s2906_s7 }
  0x48   :  { %p2474_p6 = pnand %p2472_p5, %p2469_p4 }
  0x4a   :  { %2477 = shalt.err (!%p2474_p6)
}
  0x4b   :  { %s2478_s12 = scalar_lea.vmem %s78_s18, 512  ;;  %p2483_p8 = scmp.lt.s32.totalorder %s78_s18, %s78_s18 }
  0x4c   :  { %p2479_p7 = scmp.ne.s32.totalorder %s78_s18, %s2478_s12  ;;  %p2484_p9 = scmp.lt.s32.totalorder %s2478_s12, %s2478_s12 }
  0x4e   :  { %p2485_p10 = por %p2484_p9, %p2483_p8 }
  0x50   :  { %p2486_p11 = pnand %p2485_p10, %p2479_p7 }
  0x52   :  { %2489 = shalt.err (!%p2486_p11)
}
  0x53   :  { %83 = dma.hbm_to_vmem [thread:$0]  %s2906_s7, 512, %s78_s18, [#allocation9], %s2522_s21, %s2522_s21, %s2523_s22  }
  0x54   :  { %2512 = dma.done.wait [#allocation3], 256  }
  0x55   :  { %2513 = vsyncadd [#allocation3], 4294967040 }
  0x56   :  { %2514 = dma.done.wait [#allocation6], 1024  }
  0x57   :  { %2515 = vsyncadd [#allocation6], 4294966272 }
  0x58   :  { %2516 = dma.done.wait [#allocation9], 1024  }
  0x59   :  { %2517 = vsyncadd [#allocation9], 4294966272  ;;  %v103_v0 = vld [vmem:[#allocation5] sm:$0xff]  ;;  %v104_v1 = vld [vmem:[#allocation5 + $0x8] sm:$0xff]  ;;  %vm114_vm0 = vcmask 261120   ;;  %v2527_v14 = vmov 0.0   ;;  %v370_v34 = vlaneseq }
  0x5a   :  { %v198_v2 = vld [vmem:[#allocation7] sm:$0xff]  ;;  %v2305_v3 = vpack.c.bf16 %v104_v1, %v103_v0  ;;  %v199_v4 = vld [vmem:[#allocation7 + $0x8] sm:$0xff]  ;;  %v105_v5 = vld [vmem:[#allocation5 + $0x10] sm:$0xff]  ;;  %vm2528_vm1 = vmmov 0   ;;  %vm375_vm2 = vcmask 64512   ;;  %s2530_s11 = smov 112  }
  0x5b   :  { %v106_v6 = vld [vmem:[#allocation5 + $0x18] sm:$0xff]  ;;  %v2313_v7 = vpack.c.bf16 %v199_v4, %v198_v2  ;;  %v200_v9 = vld [vmem:[#allocation7 + $0x10] sm:$0xff]  ;;  %v284_v15 = vld [vmem:[#allocation8] sm:$0xff]  ;;  %v371_v35 = vshrl.u32 %v370_v34, 7  ;;  %v373_v36 = vand.u32 127, %v370_v34  ;;  %s2532_s10 = smov [#allocation11]  }
  0x5c   :  { %v2309_v8 = vpack.c.bf16 %v106_v6, %v105_v5  ;;  %v201_v10 = vld [vmem:[#allocation7 + $0x18] sm:$0xff]  ;;  %v101_v11 = vld [vmem:[#allocation2] sm:$0xff]  ;;  %2306 = vmatprep.subr.bf16.mxu0 %v2305_v3  ;;  %v285_v16 = vld [vmem:[#allocation8 + $0x8] sm:$0xff]  ;;  %s2054_s14 = sshll.u32 %s2532_s10, 4  ;;  %s2055_s14 = int_to_ptr.vmem [resolvable:$true] %s2054_s14 }
  0x5d   :  { %v2317_v12 = vpack.c.bf16 %v201_v10, %v200_v9  ;;  %2180 = vmatprep.mubr.msk.f32.mxu0 %vm114_vm0, %v101_v11  ;;  %2314 = vmatprep.subr.bf16.mxu1 %v2313_v7  ;;  %v102_v13 = vld [vmem:[#allocation2 + $0x8] sm:$0xff]  ;;  %v286_v17 = vld [vmem:[#allocation8 + $0x10] sm:$0xff]  ;;  %v2321_v18 = vpack.c.bf16 %v285_v16, %v284_v15  ;;  %vm2718_vm3 = vcmp.ge.s32.totalorder %v371_v35, %v373_v36  ;;  %s2490_s0 = scalar_lea.vmem %s2055_s14, 256  ;;  %p2495_p13 = scmp.lt.s32.totalorder %s2055_s14, %s2055_s14 }
  0x5e   :  { %2308 = vmatpush3.bf16.msra.mxu0 %v2305_v3  ;;  %2316 = vmatpush3.bf16.msra.mxu1 %v2313_v7  ;;  %v287_v19 = vld [vmem:[#allocation8 + $0x18] sm:$0xff]  ;;  %v2068_v21 = vld [vmem:[%s2903_s4] ss:$0 sm:$0xff]  ;;  %s2529_s4 = smov 120   ;;  %p2491_p12 = scmp.ne.s32.totalorder %s2055_s14, %s2490_s0 }
  0x5f   :  { %2310 = vmatprep.subr.bf16.mxu0 %v2309_v8  ;;  %2318 = vmatprep.subr.bf16.mxu1 %v2317_v12  ;;  %v2325_v20 = vpack.c.bf16 %v287_v19, %v286_v17  ;;  %v2071_v22 = vld [vmem:[%s2904_s5] ss:$0 sm:$0xff]  ;;  %p2496_p0 = scmp.lt.s32.totalorder %s2490_s0, %s2490_s0 }
  0x60   :  { %2191 = vmatprep.mubr.msk.f32.mxu1 %vm114_vm0, %v101_v11  ;;  %v2074_v46 = vld [vmem:[%s2905_s6] ss:$0 sm:$0xff]  ;;  %s2531_s6 = smov 104  }
  0x61   :  { %p2497_p1 = por %p2496_p0, %p2495_p13 }
  0x62   :  { %2312 = vmatpush3.bf16.msra.mxu0 %v2309_v8  ;;  %2320 = vmatpush3.bf16.msra.mxu1 %v2317_v12 }
  0x63   :  { %2205 = vmatprep.subr.mxu1 %v2527_v14  ;;  %2322 = vmatprep.subr.bf16.mxu0 %v2321_v18  ;;  %p2498_p2 = pnand %p2497_p1, %p2491_p12 }
  0x65   :  { %2181 = vmatmul.mubr.msk.f32.vlgmr.msra.gmra.mrb[0].mxu0 %vm114_vm0, %v102_v13  ;;  %2192 = vmatmul.mubr.msk.f32.vlgmr.msra.gmra.mrb[0].mxu1 %vm114_vm0, %v102_v13 }
  0x66   :  { %2202 = vmatprep.mubr.msk.f32.mxu0 %vm114_vm0, %v101_v11  ;;  %2207 = vmatprep.mubr.msk.f32.mxu1 %vm2528_vm1, %v2527_v14 }
  0x67   :  { %2324 = vmatpush3.bf16.msra.mxu0 %v2321_v18 }
  0x68   :  { %2326 = vmatprep.subr.bf16.mxu0 %v2325_v20 }
  0x6b   :  { %2328 = vmatpush3.bf16.msra.mxu0 %v2325_v20 }
  0x6c   :  { %2225 = vmatprep.subr.mxu0 %v2527_v14 }
  0x6e   :  { %2203 = vmatmul.mubr.msk.f32.vlgmr.msra.gmra.mrb[2].mxu0 %vm114_vm0, %v102_v13 }
  0x6f   :  { %2227 = vmatprep.mubr.msk.f32.mxu0 %vm2528_vm1, %v2527_v14 }
 0x138   :  { %v2182_v23 = vpop.f32.mrb[0].mxu0  ;;  %v2193_v25 = vpop.f32.mrb[0].mxu1 }
 0x139   :  { %v193_v24 = vadd.f32 %v2182_v23, %v2068_v21  ;;  %v187_v26 = vpop.f32.mrb[1].mxu0  ;;  %v2690_v27 = vadd.f32 %v2193_v25, %v2071_v22  ;;  %v275_v29 = vpop.f32.mrb[1].mxu1 }
 0x13a   :  { %v188_v28 = vadd.f32 %v2068_v21, %v187_v26  ;;  %v2692_v30 = vadd.f32 %v2071_v22, %v275_v29 }
 0x13b   :  { %v2694_v31 = vmul.f32 0.35355338, %v193_v24  ;;  %783 = vrot.lane.b32.xlu1 %v2690_v27, %s2529_s4 }
 0x13c   :  { %v2696_v32 = vmul.f32 0.35355338, %v188_v28  ;;  %2206 = vmatpush3.xpose.msk.msra.mxu1 %vm375_vm2, %v2692_v30 }
 0x13d   :  { %2210 = vmatprep.subr.mxu1 %v2527_v14 }
 0x13f   :  { %781 = vrot.lane.b32.xlu1 %v2694_v31, %s2529_s4  ;;  %2208 = vmatmul.mubr.msk.f32.vlgmr.msra.gmra.mrb[2].mxu1 %vm375_vm2, %v2696_v32 }
 0x140   :  { %2211 = vmatpush3.xpose.msk.msra.mxu1 %vm375_vm2, %v2690_v27  ;;  %2212 = vmatprep.mubr.msk.f32.mxu1 %vm2528_vm1, %v2527_v14 }
 0x141   :  { %2215 = vmatprep.subr.mxu1 %v2527_v14  ;;  %v2204_v33 = vpop.f32.mrb[2].mxu0 }
 0x142   :  { %v361_v47 = vpop.f32.mrb[3].mxu0  ;;  %v2736_v49 = vadd.f32 %v2204_v33, %v2074_v46 }
 0x143   :  { %703 = vrot.lane.b32.xlu1 %v2696_v32, %s2529_s4  ;;  %2213 = vmatmul.mubr.msk.f32.vlgmr.msra.gmra.mrb[4].mxu1 %vm375_vm2, %v2694_v31  ;;  %v2731_v48 = vadd.f32 %v2074_v46, %v361_v47 }
 0x144   :  { %2217 = vmatprep.mubr.msk.f32.mxu1 %vm2528_vm1, %v2527_v14 }
 0x145   :  { %2216 = vmatpush3.msra.mxu1 %v2731_v48 }
 0x146   :  { %2220 = vmatprep.subr.mxu1 %v2527_v14 }
 0x1ad   :  { %v784_v50 = vpop.permute.xlu1 %783 }
 0x1b1   :  { %v782_v55 = vpop.permute.xlu1 %781 }
 0x1b5   :  { %v704_v59 = vpop.permute.xlu1 %703 }
 0x212   :  { %v448_v38 = vpop.f32.mrb[2].mxu1 }
 0x213   :  { %v530_v39 = vsel %vm2718_vm3, %v448_v38, -1e+30  ;;  %v2209_v40 = vpop.f32.mrb[3].mxu1  ;;  %v1039_v38 = vld [vmem:[#allocation10 + $0x8] sm:$0xff] }
 0x214   :  { %v532_v41 = vsel %vm375_vm2, %v530_v39, -inf }
 0x215   :  { %533 = vmax.xlane.f32.xlu0 %v532_v41 }
 0x216   :  { %v524_v42 = vpop.f32.mrb[4].mxu1 }
 0x217   :  { %v531_v43 = vsel %vm2718_vm3, %v524_v42, -1e+30  ;;  %v2214_v44 = vpop.f32.mrb[5].mxu1 }
 0x218   :  { %v535_v45 = vsel %vm375_vm2, %v531_v43, -inf }
 0x219   :  { %536 = vmax.xlane.f32.xlu0 %v535_v45 }
 0x22f   :  { %705 = vrot.lane.b32.xlu0 %v2692_v30, %s2529_s4 }
 0x233   :  { %959 = vrot.lane.b32.xlu0 %v2736_v49, %s2529_s4 }
 0x237   :  { %1204 = vrot.lane.b32.xlu0 %v2692_v30, %s2530_s11 }
 0x23b   :  { %1202 = vrot.lane.b32.xlu0 %v2696_v32, %s2530_s11 }
 0x23f   :  { %1282 = vrot.lane.b32.xlu0 %v2690_v27, %s2530_s11 }
 0x243   :  { %1280 = vrot.lane.b32.xlu0 %v2694_v31, %s2530_s11 }
 0x247   :  { %882 = vrot.lane.b32.xlu0 %v2731_v48, %s2529_s4 }
 0x2a2   :  { %v534_v51 = vpop.xlane.xlu0 %533 }
 0x2a3   :  { %v538_v52 = vsub.f32 %v530_v39, %v534_v51  ;;  %v702_v39 = vld [vmem:[#allocation10] sm:$0xff] }
 0x2a5   :  { %v540_v53 = vmul.f32 1.442695, %v538_v52 }
 0x2a6   :  { %v537_v54 = vpop.xlane.xlu0 %536 }
 0x2a7   :  { %2348 = vpow2.f32 %v540_v53  ;;  %v539_v56 = vsub.f32 %v531_v43, %v537_v54 }
 0x2a9   :  { %v542_v57 = vmul.f32 1.442695, %v539_v56 }
 0x2aa   :  { %v706_v58 = vpop.permute.xlu0 %705 }
 0x2ab   :  { %2350 = vpow2.f32 %v542_v57  ;;  %2226 = vmatpush3.xpose.msk.msra.mxu0 %vm375_vm2, %v706_v58 }
 0x2ac   :  { %2235 = vmatprep.subr.mxu0 %v2527_v14 }
 0x2ae   :  { %2228 = vmatmul.mubr.msk.f32.vlgmr.msra.gmra.mrb[4].mxu0 %vm375_vm2, %v704_v59  ;;  %v960_v60 = vpop.permute.xlu0 %959 }
 0x2af   :  { %2237 = vmatprep.mubr.msk.f32.mxu0 %vm2528_vm1, %v2527_v14 }
 0x2b1   :  { %v2349_v61 = vpop.eup %2348 }
 0x2b2   :  { %v1205_v62 = vpop.permute.xlu0 %1204  ;;  %v544_v63 = vsel %vm2718_vm3, %v2349_v61, 0.0 }
 0x2b3   :  { %2218 = vmatmul.mubr.msk.f32.vlgmr.msra.gmra.mrb[6].mxu1 %vm375_vm2, %v544_v63  ;;  %v546_v35 = vsel %vm375_vm2, %v544_v63, 0.0 }
 0x2b4   :  { %2221 = vmatpush3.msra.mxu1 %v2736_v49  ;;  %2222 = vmatprep.mubr.msk.f32.mxu1 %vm2528_vm1, %v2527_v14 }
 0x2b5   :  { %v2351_v0 = vpop.eup %2350  ;;  %2230 = vmatprep.subr.mxu1 %v2527_v14 }
 0x2b6   :  { %v1203_v1 = vpop.permute.xlu0 %1202  ;;  %v545_v2 = vsel %vm2718_vm3, %v2351_v0, 0.0 }
 0x2b7   :  { %2223 = vmatmul.mubr.msk.f32.vlgmr.msra.gmra.mrb[8].mxu1 %vm375_vm2, %v545_v2  ;;  %v549_v36 = vsel %vm375_vm2, %v545_v2, 0.0 }
 0x2b8   :  { %2232 = vmatprep.mubr.msk.f32.mxu1 %vm2528_vm1, %v2527_v14 }
 0x2ba   :  { %v1283_v3 = vpop.permute.xlu0 %1282 }
 0x2bb   :  { %2231 = vmatpush3.xpose.msk.msra.mxu1 %vm375_vm2, %v784_v50 }
 0x2bc   :  { %2240 = vmatprep.subr.mxu1 %v2527_v14 }
 0x2be   :  { %2233 = vmatmul.mubr.msk.f32.vlgmr.msra.gmra.mrb[10].mxu1 %vm375_vm2, %v782_v55  ;;  %v1281_v4 = vpop.permute.xlu0 %1280 }
 0x2bf   :  { %2241 = vmatpush3.msra.mxu1 %v960_v60  ;;  %2242 = vmatprep.mubr.msk.f32.mxu1 %vm2528_vm1, %v2527_v14 }
 0x2c0   :  { %2255 = vmatprep.subr.mxu1 %v2527_v14 }
 0x2c2   :  { %v883_v5 = vpop.permute.xlu0 %882 }
 0x2c3   :  { %2236 = vmatpush3.msra.mxu0 %v883_v5 }
 0x2c4   :  { %2245 = vmatprep.subr.mxu0 %v1039_v38 }
 0x381   :  { %v777_v6 = vpop.f32.mrb[4].mxu0 }
 0x382   :  { %v2229_v7 = vpop.f32.mrb[5].mxu0  ;;  %v859_v17 = vsel %vm2718_vm3, %v777_v6, -1e+30 }
 0x383   :  { %v861_v18 = vsel %vm375_vm2, %v859_v17, -inf }
 0x386   :  { %v2774_v8 = vpop.f32.mrb[6].mxu1 }
 0x387   :  { %v2219_v9 = vpop.f32.mrb[7].mxu1 }
 0x38a   :  { %v2776_v10 = vpop.f32.mrb[8].mxu1 }
 0x38b   :  { %v2224_v11 = vpop.f32.mrb[9].mxu1 }
 0x391   :  { %v855_v12 = vpop.f32.mrb[10].mxu1 }
 0x392   :  { %v860_v13 = vsel %vm2718_vm3, %v855_v12, -1e+30  ;;  %v2234_v15 = vpop.f32.mrb[11].mxu1 }
 0x393   :  { %v864_v16 = vsel %vm375_vm2, %v860_v13, -inf }
 0x394   :  { %865 = vmax.xlane.f32.xlu1 %v864_v16 }
 0x398   :  { %862 = vmax.xlane.f32.xlu1 %v861_v18 }
 0x421   :  { %v866_v19 = vpop.xlane.xlu1 %865 }
 0x422   :  { %v868_v20 = vsub.f32 %v860_v13, %v866_v19 }
 0x424   :  { %v871_v21 = vmul.f32 1.442695, %v868_v20 }
 0x425   :  { %v863_v22 = vpop.xlane.xlu1 %862 }
 0x426   :  { %2352 = vpow2.f32 %v871_v21  ;;  %v867_v23 = vsub.f32 %v859_v17, %v863_v22  ;;  %v1536_v17 = vld [vmem:[#allocation10 + $0x10] sm:$0xff] }
 0x428   :  { %v869_v24 = vmul.f32 1.442695, %v867_v23 }
 0x42a   :  { %2354 = vpow2.f32 %v869_v24 }
 0x430   :  { %v2353_v25 = vpop.eup %2352 }
 0x431   :  { %v874_v26 = vsel %vm2718_vm3, %v2353_v25, 0.0 }
 0x432   :  { %2243 = vmatmul.mubr.msk.f32.vlgmr.msra.gmra.mrb[12].mxu1 %vm375_vm2, %v874_v26  ;;  %v878_v28 = vsel %vm375_vm2, %v874_v26, 0.0 }
 0x433   :  { %2256 = vmatpush3.xpose.msk.msra.mxu1 %vm375_vm2, %v1205_v62  ;;  %879 = vadd.xlane.f32.xlu0 %v878_v28 }
 0x434   :  { %v2355_v29 = vpop.eup %2354  ;;  %2257 = vmatprep.mubr.msk.f32.mxu1 %vm2528_vm1, %v2527_v14  ;;  %2260 = vmatprep.subr.mxu1 %v2527_v14 }
 0x435   :  { %v873_v33 = vsel %vm2718_vm3, %v2355_v29, 0.0 }
 0x436   :  { %2238 = vmatmul.mubr.msk.f32.vlgmr.msra.gmra.mrb[6].mxu0 %vm375_vm2, %v873_v33  ;;  %2258 = vmatmul.mubr.msk.f32.vlgmr.msra.gmra.mrb[14].mxu1 %vm375_vm2, %v1203_v1  ;;  %v875_v34 = vsel %vm375_vm2, %v873_v33, 0.0 }
 0x437   :  { %2261 = vmatpush3.xpose.msk.msra.mxu1 %vm375_vm2, %v1283_v3  ;;  %876 = vadd.xlane.f32.xlu1 %v875_v34 }
 0x438   :  { %2262 = vmatprep.mubr.msk.f32.mxu1 %vm2528_vm1, %v2527_v14  ;;  %2270 = vmatprep.subr.mxu1 %v2527_v14 }
 0x439   :  { %2246 = vmatpush3.msra.mxu0 %v1039_v38 }
 0x43a   :  { %2263 = vmatmul.mubr.msk.f32.vlgmr.msra.gmra.mrb[16].mxu1 %vm375_vm2, %v1281_v4  ;;  %2250 = vmatprep.subr.mxu0 %v702_v39 }
 0x43b   :  { %547 = vadd.xlane.f32.xlu1 %v546_v35  ;;  %2272 = vmatprep.mubr.msk.f32.mxu1 %vm2528_vm1, %v2527_v14 }
 0x43f   :  { %550 = vadd.xlane.f32.xlu1 %v549_v36 }
 0x449   :  { %1456 = vrot.lane.b32.xlu0 %v2736_v49, %s2530_s11 }
 0x4c0   :  { %v880_v40 = vpop.xlane.xlu0 %879 }
 0x4c4   :  { %v1457_v41 = vpop.permute.xlu0 %1456  ;;  %v877_v42 = vpop.xlane.xlu1 %876 }
 0x4c5   :  { %2271 = vmatpush3.msra.mxu1 %v1457_v41  ;;  %2356 = vrcp.f32 %v877_v42 }
 0x4c6   :  { %2280 = vmatprep.subr.mxu1 %v2527_v14 }
 0x4c8   :  { %v548_v43 = vpop.xlane.xlu1 %547 }
 0x4c9   :  { %2358 = vrcp.f32 %v548_v43 }
 0x4ca   :  { %2360 = vrcp.f32 %v880_v40 }
 0x4cc   :  { %v551_v44 = vpop.xlane.xlu1 %550 }
 0x4cd   :  { %2362 = vrcp.f32 %v551_v44 }
 0x4cf   :  { %v2357_v47 = vpop.eup %2356 }
 0x4d3   :  { %v2359_v50 = vpop.eup %2358 }
 0x4d4   :  { %v2361_v53 = vpop.eup %2360  ;;  %v700_v60 = vmul.f32 %v2359_v50, %v2774_v8 }
 0x4d7   :  { %v2363_v1 = vpop.eup %2362 }
 0x4d8   :  { %v701_v2 = vmul.f32 %v2363_v1, %v2776_v10 }
 0x505   :  { %v1031_v45 = vpop.f32.mrb[12].mxu1 }
 0x506   :  { %v2244_v46 = vpop.f32.mrb[13].mxu1  ;;  %v1038_v58 = vmul.f32 %v2361_v53, %v1031_v45 }
 0x509   :  { %v954_v51 = vpop.f32.mrb[6].mxu0  ;;  %v1276_v52 = vpop.f32.mrb[14].mxu1 }
 0x50a   :  { %v1037_v54 = vmul.f32 %v2357_v47, %v954_v51  ;;  %v1358_v55 = vsel %vm2718_vm3, %v1276_v52, -1e+30  ;;  %v2239_v56 = vpop.f32.mrb[7].mxu0  ;;  %v2259_v57 = vpop.f32.mrb[15].mxu1 }
 0x50b   :  { %v1360_v59 = vsel %vm375_vm2, %v1358_v55, -inf }
 0x50c   :  { %2247 = vmatprep.mubr.msk.f32.mxu0 %vm375_vm2, %v1037_v54  ;;  %1361 = vmax.xlane.f32.xlu1 %v1360_v59  ;;  %v1954_v54 = vld [vmem:[#allocation10 + $0x18] sm:$0xff] }
 0x50d   :  { %2248 = vmatmul.mubr.msk.f32.vlgmr.msra.gmra.mrb[8].mxu0 %vm375_vm2, %v1038_v58  ;;  %v1354_v61 = vpop.f32.mrb[16].mxu1 }
 0x50e   :  { %v1359_v62 = vsel %vm2718_vm3, %v1354_v61, -1e+30  ;;  %2252 = vmatprep.mubr.msk.f32.mxu0 %vm375_vm2, %v700_v60  ;;  %v2264_v63 = vpop.f32.mrb[17].mxu1  ;;  %2251 = vmatpush3.msra.mxu0 %v702_v39 }
 0x50f   :  { %v1363_v0 = vsel %vm375_vm2, %v1359_v62, -inf  ;;  %2265 = vmatprep.subr.mxu0 %v2527_v14 }
 0x510   :  { %1364 = vmax.xlane.f32.xlu1 %v1363_v0  ;;  %v2109_v0 = vld [vmem:[%s2907_s8] ss:$0 sm:$0xff] }
 0x515   :  { %2253 = vmatmul.mubr.msk.f32.vlgmr.msra.gmra.mrb[8].mxu0 %vm375_vm2, %v701_v2 }
 0x516   :  { %2267 = vmatprep.mubr.msk.f32.mxu0 %vm2528_vm1, %v2527_v14 }
 0x521   :  { %1380 = vrot.lane.b32.xlu1 %v2731_v48, %s2530_s11 }
 0x525   :  { %1622 = vrot.lane.b32.xlu1 %v2692_v30, %s2531_s6 }
 0x599   :  { %v1362_v3 = vpop.xlane.xlu1 %1361 }
 0x59a   :  { %v1366_v4 = vsub.f32 %v1358_v55, %v1362_v3 }
 0x59c   :  { %v1368_v5 = vmul.f32 1.442695, %v1366_v4 }
 0x59d   :  { %v1365_v6 = vpop.xlane.xlu1 %1364 }
 0x59e   :  { %2364 = vpow2.f32 %v1368_v5  ;;  %v1367_v7 = vsub.f32 %v1359_v62, %v1365_v6 }
 0x5a0   :  { %v1370_v8 = vmul.f32 1.442695, %v1367_v7 }
 0x5a1   :  { %v1381_v9 = vpop.permute.xlu1 %1380 }
 0x5a2   :  { %2366 = vpow2.f32 %v1370_v8  ;;  %2266 = vmatpush3.msra.mxu0 %v1381_v9 }
 0x5a3   :  { %2275 = vmatprep.subr.mxu0 %v1536_v17 }
 0x5a5   :  { %v1623_v15 = vpop.permute.xlu1 %1622 }
 0x5a8   :  { %v2365_v10 = vpop.eup %2364 }
 0x5a9   :  { %v1372_v11 = vsel %vm2718_vm3, %v2365_v10, 0.0 }
 0x5aa   :  { %2268 = vmatmul.mubr.msk.f32.vlgmr.msra.gmra.mrb[10].mxu0 %vm375_vm2, %v1372_v11  ;;  %v1374_v12 = vsel %vm375_vm2, %v1372_v11, 0.0 }
 0x5ab   :  { %1375 = vadd.xlane.f32.xlu1 %v1374_v12  ;;  %2276 = vmatpush3.msra.mxu0 %v1536_v17 }
 0x5ac   :  { %v2367_v30 = vpop.eup %2366  ;;  %2285 = vmatprep.subr.mxu0 %v2527_v14 }
 0x5ad   :  { %v1373_v13 = vsel %vm2718_vm3, %v2367_v30, 0.0 }
 0x5ae   :  { %2273 = vmatmul.mubr.msk.f32.vlgmr.msra.gmra.mrb[18].mxu1 %vm375_vm2, %v1373_v13  ;;  %v1377_v16 = vsel %vm375_vm2, %v1373_v13, 0.0 }
 0x5af   :  { %2281 = vmatpush3.xpose.msk.msra.mxu1 %vm375_vm2, %v1623_v15  ;;  %1378 = vadd.xlane.f32.xlu0 %v1377_v16 }
 0x5b0   :  { %2282 = vmatprep.mubr.msk.f32.mxu1 %vm2528_vm1, %v2527_v14  ;;  %2290 = vmatprep.subr.mxu1 %v2527_v14 }
 0x5bc   :  { %1620 = vrot.lane.b32.xlu1 %v2696_v32, %s2531_s6 }
 0x5c0   :  { %1698 = vrot.lane.b32.xlu1 %v2694_v31, %s2531_s6 }
 0x5c5   :  { %1700 = vrot.lane.b32.xlu0 %v2690_v27, %s2531_s6 }
 0x638   :  { %v1376_v18 = vpop.xlane.xlu1 %1375 }
 0x639   :  { %2368 = vrcp.f32 %v1376_v18 }
 0x63c   :  { %v1621_v19 = vpop.permute.xlu1 %1620  ;;  %v1379_v32 = vpop.xlane.xlu0 %1378 }
 0x63d   :  { %2283 = vmatmul.mubr.msk.f32.vlgmr.msra.gmra.mrb[20].mxu1 %vm375_vm2, %v1621_v19  ;;  %2370 = vrcp.f32 %v1379_v32 }
 0x63e   :  { %2292 = vmatprep.mubr.msk.f32.mxu1 %vm2528_vm1, %v2527_v14 }
 0x640   :  { %v1701_v26 = vpop.permute.xlu0 %1700  ;;  %v1699_v28 = vpop.permute.xlu1 %1698 }
 0x643   :  { %v2369_v20 = vpop.eup %2368 }
 0x647   :  { %v2371_v23 = vpop.eup %2370 }
 0x67d   :  { %v1452_v31 = vpop.f32.mrb[10].mxu0 }
 0x67e   :  { %v1534_v21 = vmul.f32 %v2369_v20, %v1452_v31  ;;  %v2269_v22 = vpop.f32.mrb[11].mxu0 }
 0x680   :  { %2277 = vmatprep.mubr.msk.f32.mxu0 %vm375_vm2, %v1534_v21 }
 0x681   :  { %v1528_v24 = vpop.f32.mrb[18].mxu1 }
 0x682   :  { %v1535_v25 = vmul.f32 %v2371_v23, %v1528_v24  ;;  %v2274_v27 = vpop.f32.mrb[19].mxu1 }
 0x684   :  { %2278 = vmatmul.mubr.msk.f32.vlgmr.msra.gmra.mrb[8].mxu0 %vm375_vm2, %v1535_v25 }
 0x685   :  { %2286 = vmatpush3.xpose.msk.msra.mxu0 %vm375_vm2, %v1701_v26  ;;  %2287 = vmatprep.mubr.msk.f32.mxu0 %vm2528_vm1, %v2527_v14 }
 0x686   :  { %2295 = vmatprep.subr.mxu0 %v2527_v14 }
 0x688   :  { %2288 = vmatmul.mubr.msk.f32.vlgmr.msra.gmra.mrb[12].mxu0 %vm375_vm2, %v1699_v28 }
 0x689   :  { %2297 = vmatprep.mubr.msk.f32.mxu0 %vm2528_vm1, %v2527_v14 }
 0x710   :  { %v1694_v29 = vpop.f32.mrb[20].mxu1 }
 0x711   :  { %v1776_v33 = vsel %vm2718_vm3, %v1694_v29, -1e+30  ;;  %v2284_v34 = vpop.f32.mrb[21].mxu1 }
 0x712   :  { %v1778_v35 = vsel %vm375_vm2, %v1776_v33, -inf }
 0x713   :  { %1779 = vmax.xlane.f32.xlu1 %v1778_v35 }
 0x724   :  { %1798 = vrot.lane.b32.xlu1 %v2731_v48, %s2531_s6 }
 0x75b   :  { %v1772_v36 = vpop.f32.mrb[12].mxu0 }
 0x75c   :  { %v1777_v38 = vsel %vm2718_vm3, %v1772_v36, -1e+30  ;;  %v2289_v39 = vpop.f32.mrb[13].mxu0 }
 0x75d   :  { %v1781_v40 = vsel %vm375_vm2, %v1777_v38, -inf }
 0x75e   :  { %1782 = vmax.xlane.f32.xlu0 %v1781_v40 }
 0x774   :  { %1874 = vrot.lane.b32.xlu0 %v2736_v49, %s2531_s6 }
 0x7a0   :  { %v1780_v14 = vpop.xlane.xlu1 %1779 }
 0x7a1   :  { %v1784_v41 = vsub.f32 %v1776_v33, %v1780_v14 }
 0x7a3   :  { %v1786_v42 = vmul.f32 1.442695, %v1784_v41 }
 0x7a4   :  { %v1799_v43 = vpop.permute.xlu1 %1798 }
 0x7a5   :  { %2372 = vpow2.f32 %v1786_v42  ;;  %2291 = vmatpush3.msra.mxu1 %v1799_v43 }
 0x7af   :  { %v2373_v44 = vpop.eup %2372 }
 0x7b0   :  { %v1790_v48 = vsel %vm2718_vm3, %v2373_v44, 0.0 }
 0x7b1   :  { %2293 = vmatmul.mubr.msk.f32.vlgmr.msra.gmra.mrb[22].mxu1 %vm375_vm2, %v1790_v48  ;;  %v1792_v45 = vsel %vm375_vm2, %v1790_v48, 0.0 }
 0x7b2   :  { %1793 = vadd.xlane.f32.xlu1 %v1792_v45 }
 0x7eb   :  { %v1783_v46 = vpop.xlane.xlu0 %1782 }
 0x7ec   :  { %v1785_v47 = vsub.f32 %v1777_v38, %v1783_v46 }
 0x7ee   :  { %v1788_v50 = vmul.f32 1.442695, %v1785_v47 }
 0x7ef   :  { %v1875_v51 = vpop.permute.xlu0 %1874 }
 0x7f0   :  { %2374 = vpow2.f32 %v1788_v50  ;;  %2296 = vmatpush3.msra.mxu0 %v1875_v51 }
 0x7f1   :  { %2300 = vmatprep.subr.mxu0 %v1954_v54 }
 0x7fa   :  { %v2375_v49 = vpop.eup %2374 }
 0x7fb   :  { %v1791_v52 = vsel %vm2718_vm3, %v2375_v49, 0.0 }
 0x7fc   :  { %2298 = vmatmul.mubr.msk.f32.vlgmr.msra.gmra.mrb[14].mxu0 %vm375_vm2, %v1791_v52  ;;  %v1795_v53 = vsel %vm375_vm2, %v1791_v52, 0.0 }
 0x7fd   :  { %1796 = vadd.xlane.f32.xlu0 %v1795_v53  ;;  %2301 = vmatpush3.msra.mxu0 %v1954_v54 }
 0x83f   :  { %v1794_v55 = vpop.xlane.xlu1 %1793 }
 0x840   :  { %2376 = vrcp.f32 %v1794_v55 }
 0x84a   :  { %v2377_v56 = vpop.eup %2376 }
 0x884   :  { %v1870_v57 = vpop.f32.mrb[22].mxu1 }
 0x885   :  { %v1952_v58 = vmul.f32 %v2377_v56, %v1870_v57  ;;  %v2294_v59 = vpop.f32.mrb[23].mxu1 }
 0x887   :  { %2302 = vmatprep.mubr.msk.f32.mxu0 %vm375_vm2, %v1952_v58 }
 0x88a   :  { %v1797_v60 = vpop.xlane.xlu0 %1796 }
 0x88b   :  { %2378 = vrcp.f32 %v1797_v60 }
 0x895   :  { %v2379_v37 = vpop.eup %2378 }
 0x8cf   :  { %v1946_v61 = vpop.f32.mrb[14].mxu0 }
 0x8d0   :  { %v1953_v62 = vmul.f32 %v2379_v37, %v1946_v61  ;;  %v2299_v63 = vpop.f32.mrb[15].mxu0 }
 0x8d2   :  { %2303 = vmatmul.mubr.msk.f32.vlgmr.msra.gmra.mrb[8].mxu0 %vm375_vm2, %v1953_v62 }
 0x9a5   :  { %v2304_v1 = vpop.f32.mrb[8].mxu0 }
 0x9a6   :  { %v2046_v2 = vadd.f32 %v2304_v1, %v2109_v0  ;;  %v2027_v3 = vpop.f32.mrb[9].mxu0 }
 0x9a7   :  { %v2045_v4 = vadd.f32 %v2109_v0, %v2027_v3 }
 0x9a8   :  { %2048 = vst.msk [vmem:[#allocation11 + $0x8] sm:$0xff] %vm114_vm0, %v2046_v2 }
 0x9a9   :  { %2047 = vst.msk [vmem:[#allocation11] sm:$0xff] %vm114_vm0, %v2045_v4 }
 0x9aa   :  { %2501 = shalt.err (!%p2498_p2)
}
 0x9ab   :  { %s2502_s16 = scalar_lea.hbm %s2908_s9, 256 }
 0x9ac   :  { %p2503_p3 = scmp.ne.s32.totalorder %s2908_s9, %s2502_s16  ;;  %p2506_p4 = scmp.lt.u32.totalorder %s2502_s16, %s2908_s9 }
 0x9ae   :  { %p2508_p5 = pnand %p2506_p4, %p2503_p3 }
 0x9b0   :  { %2511 = shalt.err (!%p2508_p5)
}
 0x9b1   :  { %2060 = dma.vmem_to_hbm [thread:$0]  %s2055_s14, 256, %s2908_s9, [#allocation4], %s2522_s21, %s2522_s21, %s2523_s22  }
 0x9b2   :  { %2518 = dma.done.wait [#allocation4], 256  }
 0x9b3   :  { %2519 = vsyncadd [#allocation4], 4294967040 }
 0x9b4   :  { %2064 = vsyncpa [#allocation3], 1 }
 0x9b5   :  { %2065 = vsyncpa [#allocation6], 1 }
 0x9b6   :  { %2066 = vsyncpa [#allocation9], 1 }
 0x9b7   :  { %2067 = vsyncpa [#allocation4], 1 }

</bundles_post_ra>
